<compile_context>
chip_gen: v5e
topology: v5e:2x2
jax: 0.10.0
libtpu: 0.0.40
codegen_flags: <defaults>
</compile_context>

<pallas_src>
import math
from functools import partial

import jax
import jax.numpy as jnp
from jax.experimental import pallas as pl
from jax.experimental.pallas import tpu as pltpu


def _h_swish_kernel(x_ref, o_ref):
    x = x_ref[...].astype(jnp.float32)
    # relu6(x + 3) / 6  -> clamp(x + 3, 0, 6) * (1/6); all VPU elementwise ops.
    hs = jnp.clip(x + 3.0, 0.0, 6.0) * (1.0 / 6.0)
    o_ref[...] = (x * hs).astype(o_ref.dtype)


@partial(jax.jit, static_argnames=("lane", "tile_rows"))
def h_swish(x: jax.Array, *, lane: int = 512, tile_rows: int = 1024) -> jax.Array:
    """Elementwise h_swish on any-shape tensor via a lane-dense Pallas TPU kernel."""
    orig_shape = x.shape
    orig_dtype = x.dtype
    total = math.prod(orig_shape)

    flat = x.reshape(total)

    # Rows of a lane-dense (rows, lane) slab; lane is a multiple of 128.
    rows = -(-total // lane)
    if rows <= tile_rows:
        # Single block == full array (always a legal block shape).
        tr = rows
        rows_padded = rows
        grid = (1,)
    else:
        # Multi-block: align rows to the 8-row sublane granule only; the last
        # (possibly ragged) grid block is masked by Pallas, so no need to pad
        # all the way up to a TILE_ROWS multiple.
        tr = tile_rows
        rows_padded = -(-rows // 8) * 8
        grid = (pl.cdiv(rows_padded, tr),)

    padded_total = rows_padded * lane
    if padded_total != total:
        flat = jnp.pad(flat, (0, padded_total - total))

    x2d = flat.reshape(rows_padded, lane)
    nbytes = padded_total * x2d.dtype.itemsize

    out2d = pl.pallas_call(
        _h_swish_kernel,
        out_shape=jax.ShapeDtypeStruct((rows_padded, lane), orig_dtype),
        grid=grid,
        in_specs=[pl.BlockSpec((tr, lane), lambda i: (i, 0))],
        out_specs=pl.BlockSpec((tr, lane), lambda i: (i, 0)),
        compiler_params=pltpu.CompilerParams(
            dimension_semantics=("parallel",),
        ),
        cost_estimate=pl.CostEstimate(
            flops=5 * padded_total,
            transcendentals=0,
            bytes_accessed=2 * nbytes,
        ),
    )(x2d)

    out_flat = out2d.reshape(padded_total)
    if padded_total != total:
        out_flat = out_flat[:total]
    return out_flat.reshape(orig_shape)


def _h_swish_ref(x: jax.Array) -> jax.Array:
    return x * (jnp.clip(x + 3.0, 0.0, 6.0) / 6.0)


if __name__ == "__main__":
    key = jax.random.PRNGKey(0)

    # NCHW, matching PyTorch conv/activation conventions (exact slab fit).
    x = jax.random.normal(key, (2, 4, 16, 16), dtype=jnp.float32) * 4.0
    out = jax.block_until_ready(h_swish(x))
    ref = _h_swish_ref(x)
    assert out.shape == x.shape and out.dtype == x.dtype
    assert jnp.allclose(out, ref, atol=1e-6, rtol=1e-6)

    # Odd shape to exercise the padding / slicing path.
    x2 = jax.random.normal(jax.random.PRNGKey(1), (2, 3, 7, 5), dtype=jnp.float32) * 4.0
    out2 = jax.block_until_ready(h_swish(x2))
    ref2 = _h_swish_ref(x2)
    assert out2.shape == x2.shape and out2.dtype == x2.dtype
    assert jnp.allclose(out2, ref2, atol=1e-6, rtol=1e-6)

    # Larger shape to exercise the multi-block (ragged last block) path.
    x3 = jax.random.normal(jax.random.PRNGKey(2), (3, 8, 177, 131), dtype=jnp.float32) * 4.0
    out3 = jax.block_until_ready(h_swish(x3))
    ref3 = _h_swish_ref(x3)
    assert out3.shape == x3.shape and out3.dtype == x3.dtype
    assert jnp.allclose(out3, ref3, atol=1e-6, rtol=1e-6)

    # bf16 path (compute stays in f32 inside the kernel).
    x4 = (jax.random.normal(jax.random.PRNGKey(3), (2, 4, 16, 16), dtype=jnp.float32) * 4.0
          ).astype(jnp.bfloat16)
    out4 = jax.block_until_ready(h_swish(x4))
    ref4 = _h_swish_ref(x4.astype(jnp.float32)).astype(jnp.bfloat16)
    assert out4.shape == x4.shape and out4.dtype == x4.dtype
    assert jnp.allclose(out4.astype(jnp.float32), ref4.astype(jnp.float32),
                        atol=2e-2, rtol=2e-2)

    print("KERNEL_OK")
</pallas_src>

<mosaic_0001>
module attributes {stable_mosaic.version = 11 : i64} {
  func.func @_h_swish_kernel(%arg0: i32, %arg1: memref<4x512xf32, #tpu.memory_space<vmem>>, %arg2: memref<4x512xf32, #tpu.memory_space<vmem>>) attributes {dimension_semantics = [#tpu.dimension_semantics<parallel>], iteration_bounds = array<i64: 1>, scalar_prefetch = 0 : i64, scratch_operands = 0 : i64, tpu.core_type = #tpu.core_type<tc>, window_params = [{transform_indices = @transform_0, window_bounds = array<i64: 4, 512>}, {transform_indices = @transform_1, window_bounds = array<i64: 4, 512>}]} {
    %c0 = arith.constant 0 : index
    %c0_0 = arith.constant 0 : index
    %0 = vector.load %arg1[%c0, %c0_0] : memref<4x512xf32, #tpu.memory_space<vmem>>, vector<4x512xf32>
    %cst = arith.constant 3.000000e+00 : f32
    %1 = vector.broadcast %cst : f32 to vector<4x512xf32>
    %2 = arith.addf %0, %1 : vector<4x512xf32>
    %cst_1 = arith.constant 0.000000e+00 : f32
    %cst_2 = arith.constant 6.000000e+00 : f32
    %3 = vector.broadcast %cst_1 : f32 to vector<4x512xf32>
    %4 = arith.maximumf %3, %2 : vector<4x512xf32>
    %5 = vector.broadcast %cst_2 : f32 to vector<4x512xf32>
    %6 = arith.minimumf %5, %4 : vector<4x512xf32>
    %cst_3 = arith.constant 0.166666672 : f32
    %7 = vector.broadcast %cst_3 : f32 to vector<4x512xf32>
    %8 = arith.mulf %6, %7 : vector<4x512xf32>
    %9 = arith.mulf %0, %8 : vector<4x512xf32>
    %c0_4 = arith.constant 0 : index
    %c0_5 = arith.constant 0 : index
    %10 = vector.load %arg2[%c0_4, %c0_5] : memref<4x512xf32, #tpu.memory_space<vmem>>, vector<4x512xf32>
    tpu.vector_store %arg2[%c0_4, %c0_5], %9 {strides = array<i32>} : memref<4x512xf32, #tpu.memory_space<vmem>>, vector<4x512xf32>,
    return
  }
  func.func @transform_0(%arg0: i32) -> (i32, i32) {
    %c0_i32 = arith.constant 0 : i32
    %c0_i32_0 = arith.constant 0 : i32
    return %arg0, %c0_i32 : i32, i32
  }
  func.func @transform_1(%arg0: i32) -> (i32, i32) {
    %c0_i32 = arith.constant 0 : i32
    %c0_i32_0 = arith.constant 0 : i32
    return %arg0, %c0_i32 : i32, i32
  }
}

</mosaic_0001>

<bundles_post_ra>
// kernel: h_swish.1
= control target key start
LH: loop header
LB: loop body
LE: loop exit
PB: predicated region body
PF: predicated region fallthrough
CT: control target
= control target key end

     0   :  { %s48_s0 = inlined_call_operand.vmem [shape: f32[4,512], index: 0, kind: input, shape index: {}]   ;;  %s49_s1 = inlined_call_operand.vmem [shape: f32[4,512], index: 1, kind: output, shape index: {}]  }
   0x1   :  { %v8_v0 = vld [vmem:[%s48_s0] sm:$0xff]  ;;  %v9_v1 = vld [vmem:[%s48_s0 + $0x8] sm:$0xff] }
   0x2   :  { %v10_v2 = vadd.f32 3.0, %v8_v0  ;;  %v11_v3 = vadd.f32 3.0, %v9_v1 }
   0x4   :  { %v12_v4 = vmax.f32 %v10_v2, 0.0  ;;  %v13_v5 = vmax.f32 %v11_v3, 0.0 }
   0x6   :  { %v14_v6 = vmin.f32 %v12_v4, 6.0  ;;  %v15_v7 = vmin.f32 %v13_v5, 6.0 }
   0x8   :  { %v16_v8 = vmul.f32 0.16666667, %v14_v6  ;;  %v17_v9 = vmul.f32 0.16666667, %v15_v7 }
   0xa   :  { %v18_v10 = vmul.f32 %v16_v8, %v8_v0  ;;  %v19_v11 = vmul.f32 %v17_v9, %v9_v1 }
   0xc   :  { %20 = vst [vmem:[%s49_s1] sm:$0xff] %v18_v10 }
   0xd   :  { %21 = vst [vmem:[%s49_s1 + $0x8] sm:$0xff] %v19_v11 }

</bundles_post_ra>
